<compile_context>
chip_gen: v7x
topology: tpu7x:2x2x1
jax: 0.10.0
libtpu: 0.0.40
codegen_flags: <defaults>
</compile_context>

<pallas_src>
import jax
import jax.numpy as jnp
import numpy as np
from jax import lax
from jax.experimental import pallas as pl
from jax.experimental.pallas import tpu as pltpu


def _gtr_kernel(x_ref, wih_ref, whh_ref, brnn_ref, wd_ref, bd_ref, o_ref, acc_ref):
    Bt, T, D = x_ref.shape
    H = wih_ref.shape[1]
    O = wd_ref.shape[1]

    # ---- phase 1: input projection for all T steps in one MXU matmul (bias pre-fused),
    #      written to VMEM scratch instead of being held as live vregs ----
    x2d = x_ref[...].reshape(Bt * T, D)
    xp = jnp.dot(x2d, wih_ref[...], preferred_element_type=jnp.float32) + brnn_ref[...]
    acc_ref[...] = xp.reshape(Bt, T, H)

    whh = whh_ref[...]                      # (H, H) stays resident; only weight in vregs

    # ---- phase 2: serial recurrence; h is the loop carry, everything else is VMEM ----
    def step(t, h):
        xp_t = acc_ref[:, pl.ds(t, 1), :][:, 0, :]                    # (Bt, H) from scratch
        h_new = jnp.tanh(xp_t + jnp.dot(h, whh, preferred_element_type=jnp.float32))
        # store a1_t = tanh(h_t) in place: the head's first tanh is off the carry chain
        acc_ref[:, pl.ds(t, 1), :] = jnp.tanh(h_new)[:, None, :]
        return h_new

    lax.fori_loop(0, T, step, jnp.zeros((Bt, H), jnp.float32), unroll=min(int(T), 8))

    # ---- phase 3: dense head for all T in one MXU matmul + single bulk store ----
    a1 = acc_ref[...].reshape(Bt * T, H)
    dense = jnp.dot(a1, wd_ref[...], preferred_element_type=jnp.float32) + bd_ref[...]
    o_ref[...] = jnp.tanh(dense).reshape(Bt, T, O).astype(o_ref.dtype)


def _pick_b_tile(B, T, D, H, O, budget_bytes=16 << 20, cap=128):
    """Largest divisor of B (<= cap) whose per-block working set stays under budget.

    Working set per block (f32): x + out double-buffered by BlockSpec pipelining,
    plus the single h/a1 scratch. Budget is conservative so it also fits v7x's 64 MiB
    VMEM with headroom; v5e/v6e (128 MiB) trivially fit.
    """
    per_row = T * (2 * D + 2 * O + H) * 4
    best = 1
    for bt in range(1, min(B, cap) + 1):
        if B % bt == 0 and bt * per_row <= budget_bytes:
            best = bt
    return best


def prepare_params(params):
    """One-time parameter prep (hoisted out of the per-call path): transposes + bias fusion."""
    w_ih, w_hh, b_ih, b_hh, w_d, b_d = params
    H = w_ih.shape[0]
    O = w_d.shape[0]
    return (
        jnp.transpose(w_ih),                 # (D, H)
        jnp.transpose(w_hh),                 # (H, H)
        (b_ih + b_hh).reshape(1, H),         # fused RNN bias
        jnp.transpose(w_d),                  # (H, O)
        b_d.reshape(1, O),
    )


def gtr_forward(x, prepared_params, *, b_tile=None):
    """x: (B, T, input_size) float32, batch_first like the PyTorch module."""
    B, T, D = x.shape
    wih_t, whh_t, b_rnn, wd_t, bd = prepared_params
    H = wih_t.shape[1]
    O = wd_t.shape[1]

    if b_tile is None:
        b_tile = _pick_b_tile(B, T, D, H, O)
    assert B % b_tile == 0, "batch must be divisible by the chosen batch tile"
    grid = (B // b_tile,)

    # scoped VMEM limit: at least the 32 MiB default, never above 64 MiB (v7x physical/TC)
    per_block_bytes = b_tile * T * (2 * D + 2 * O + H) * 4
    vmem_limit = int(min(64 << 20, max(32 << 20, 2 * per_block_bytes)))

    return pl.pallas_call(
        _gtr_kernel,
        out_shape=jax.ShapeDtypeStruct((B, T, O), jnp.float32),
        grid_spec=pltpu.PrefetchScalarGridSpec(
            num_scalar_prefetch=0,
            grid=grid,
            in_specs=[
                pl.BlockSpec((b_tile, T, D), lambda b: (b, 0, 0)),   # x, pipelined per tile
                pl.BlockSpec((D, H), lambda b: (0, 0)),              # W_ih^T (constant block)
                pl.BlockSpec((H, H), lambda b: (0, 0)),              # W_hh^T (constant block)
                pl.BlockSpec((1, H), lambda b: (0, 0)),              # fused RNN bias
                pl.BlockSpec((H, O), lambda b: (0, 0)),              # W_d^T (constant block)
                pl.BlockSpec((1, O), lambda b: (0, 0)),              # dense bias
            ],
            out_specs=pl.BlockSpec((b_tile, T, O), lambda b: (b, 0, 0)),
            scratch_shapes=[pltpu.VMEM((b_tile, T, H), jnp.float32)],  # xp -> tanh(h_t) slots
        ),
        compiler_params=pltpu.CompilerParams(
            dimension_semantics=("parallel",),       # batch tiles are independent (megacore)
            vmem_limit_bytes=vmem_limit,
        ),
    )(x, wih_t, whh_t, b_rnn, wd_t, bd)


def gtr_forward_ref(x, params):
    """Pure-JAX reference (matches torch nn.RNN(tanh) -> tanh -> Linear -> tanh)."""
    w_ih, w_hh, b_ih, b_hh, w_d, b_d = params
    B, T, D = x.shape
    H = w_ih.shape[0]

    def step(h, x_t):
        h_new = jnp.tanh(x_t @ w_ih.T + b_ih + h @ w_hh.T + b_hh)
        return h_new, h_new

    h0 = jnp.zeros((B, H), jnp.float32)
    _, hs = jax.lax.scan(step, h0, jnp.transpose(x, (1, 0, 2)))
    out = jnp.transpose(hs, (1, 0, 2))       # (B, T, H)
    a1 = jnp.tanh(out)
    dense = a1 @ w_d.T + b_d
    return jnp.tanh(dense)


def init_params(key, input_size, hidden_size, output_size):
    # deterministic uniform init (same scheme as PyTorch's default: U(-1/sqrt(H), 1/sqrt(H)))
    k = 1.0 / np.sqrt(hidden_size)
    keys = jax.random.split(key, 6)
    w_ih = jax.random.uniform(keys[0], (hidden_size, input_size), jnp.float32, -k, k)
    w_hh = jax.random.uniform(keys[1], (hidden_size, hidden_size), jnp.float32, -k, k)
    b_ih = jax.random.uniform(keys[2], (hidden_size,), jnp.float32, -k, k)
    b_hh = jax.random.uniform(keys[3], (hidden_size,), jnp.float32, -k, k)
    w_d = jax.random.uniform(keys[4], (output_size, hidden_size), jnp.float32, -k, k)
    b_d = jax.random.uniform(keys[5], (output_size,), jnp.float32, -k, k)
    return (w_ih, w_hh, b_ih, b_hh, w_d, b_d)


if __name__ == "__main__":
    B, T = 2, 8                 # batch, window (seq length)
    input_size = 4
    hidden_size = 32
    output_size = 4

    key = jax.random.PRNGKey(0)
    kx, kp = jax.random.split(key)
    x = jax.random.normal(kx, (B, T, input_size), jnp.float32)
    params = init_params(kp, input_size, hidden_size, output_size)

    prepared = prepare_params(params)       # one-time prep, not in the per-call path
    out = gtr_forward(x, prepared)
    out = jax.block_until_ready(out)

    ref = gtr_forward_ref(x, params)
    np.testing.assert_allclose(np.asarray(out), np.asarray(ref), rtol=1e-5, atol=1e-5)

    print("KERNEL_OK")
</pallas_src>

<mosaic_0001>
module attributes {stable_mosaic.version = 11 : i64} {
  func.func @_gtr_kernel(%arg0: i32, %arg1: memref<2x8x4xf32, #tpu.memory_space<vmem>>, %arg2: memref<4x32xf32, #tpu.memory_space<vmem>>, %arg3: memref<32x32xf32, #tpu.memory_space<vmem>>, %arg4: memref<1x32xf32, #tpu.memory_space<vmem>>, %arg5: memref<32x4xf32, #tpu.memory_space<vmem>>, %arg6: memref<1x4xf32, #tpu.memory_space<vmem>>, %arg7: memref<2x8x4xf32, #tpu.memory_space<vmem>>, %arg8: memref<2x8x32xf32, #tpu.memory_space<vmem>>) attributes {dimension_semantics = [#tpu.dimension_semantics<parallel>], iteration_bounds = array<i64: 1>, scalar_prefetch = 0 : i64, scratch_operands = 1 : i64, tpu.core_type = #tpu.core_type<tc>, window_params = [{transform_indices = @transform_0, window_bounds = array<i64: 2, 8, 4>}, {pipeline_mode = #tpu.pipeline_mode<synchronous>, transform_indices = @transform_1, window_bounds = array<i64: 4, 32>}, {pipeline_mode = #tpu.pipeline_mode<synchronous>, transform_indices = @transform_2, window_bounds = array<i64: 32, 32>}, {pipeline_mode = #tpu.pipeline_mode<synchronous>, transform_indices = @transform_3, window_bounds = array<i64: 1, 32>}, {pipeline_mode = #tpu.pipeline_mode<synchronous>, transform_indices = @transform_4, window_bounds = array<i64: 32, 4>}, {pipeline_mode = #tpu.pipeline_mode<synchronous>, transform_indices = @transform_5, window_bounds = array<i64: 1, 4>}, {transform_indices = @transform_6, window_bounds = array<i64: 2, 8, 4>}]} {
    %c0 = arith.constant 0 : index
    %c0_0 = arith.constant 0 : index
    %c0_1 = arith.constant 0 : index
    %0 = vector.load %arg1[%c0, %c0_0, %c0_1] : memref<2x8x4xf32, #tpu.memory_space<vmem>>, vector<2x8x4xf32>
    %1 = vector.shape_cast %0 : vector<2x8x4xf32> to vector<16x4xf32>
    %c0_2 = arith.constant 0 : index
    %c0_3 = arith.constant 0 : index
    %2 = vector.load %arg2[%c0_2, %c0_3] : memref<4x32xf32, #tpu.memory_space<vmem>>, vector<4x32xf32>
    %cst = arith.constant dense<0.000000e+00> : vector<16x32xf32>
    %3 = tpu.matmul %1, %2, %cst {dimension_numbers = #tpu.dot_dimension_numbers<[1], [0], [0], [1], [0, 0, 1, 1], [], []>} : vector<16x4xf32>, vector<4x32xf32>, vector<16x32xf32> -> vector<16x32xf32>
    %c0_4 = arith.constant 0 : index
    %c0_5 = arith.constant 0 : index
    %4 = vector.load %arg4[%c0_4, %c0_5] : memref<1x32xf32, #tpu.memory_space<vmem>>, vector<1x32xf32>
    %5 = vector.broadcast %4 : vector<1x32xf32> to vector<16x32xf32>
    %6 = arith.addf %3, %5 : vector<16x32xf32>
    %7 = vector.shape_cast %6 : vector<16x32xf32> to vector<2x8x32xf32>
    %c0_6 = arith.constant 0 : index
    %c0_7 = arith.constant 0 : index
    %c0_8 = arith.constant 0 : index
    %8 = vector.load %arg8[%c0_6, %c0_7, %c0_8] : memref<2x8x32xf32, #tpu.memory_space<vmem>>, vector<2x8x32xf32>
    tpu.vector_store %arg8[%c0_6, %c0_7, %c0_8], %7 {strides = array<i32>} : memref<2x8x32xf32, #tpu.memory_space<vmem>>, vector<2x8x32xf32>,
    %c0_9 = arith.constant 0 : index
    %c0_10 = arith.constant 0 : index
    %9 = vector.load %arg3[%c0_9, %c0_10] : memref<32x32xf32, #tpu.memory_space<vmem>>, vector<32x32xf32>
    %cst_11 = arith.constant 0.000000e+00 : f32
    %10 = vector.broadcast %cst_11 : f32 to vector<2x32xf32>
    %c0_i32 = arith.constant 0 : i32
    %c0_12 = arith.constant 0 : index
    %11 = arith.index_cast %c0_i32 : i32 to index
    %c0_13 = arith.constant 0 : index
    %12 = vector.load %arg8[%c0_12, %11, %c0_13] : memref<2x8x32xf32, #tpu.memory_space<vmem>>, vector<2x1x32xf32>
    %13 = vector.shape_cast %12 : vector<2x1x32xf32> to vector<2x32xf32>
    %cst_14 = arith.constant dense<0.000000e+00> : vector<2x32xf32>
    %14 = tpu.matmul %10, %9, %cst_14 {dimension_numbers = #tpu.dot_dimension_numbers<[1], [0], [0], [1], [0, 0, 1, 1], [], []>} : vector<2x32xf32>, vector<32x32xf32>, vector<2x32xf32> -> vector<2x32xf32>
    %15 = arith.addf %13, %14 : vector<2x32xf32>
    %16 = math.tanh %15 : vector<2x32xf32>
    %17 = math.tanh %16 : vector<2x32xf32>
    %18 = vector.shape_cast %17 : vector<2x32xf32> to vector<2x1x32xf32>
    %c0_15 = arith.constant 0 : index
    %19 = arith.index_cast %c0_i32 : i32 to index
    %c0_16 = arith.constant 0 : index
    %20 = vector.load %arg8[%c0_15, %19, %c0_16] : memref<2x8x32xf32, #tpu.memory_space<vmem>>, vector<2x1x32xf32>
    tpu.vector_store %arg8[%c0_15, %19, %c0_16], %18 {strides = array<i32>} : memref<2x8x32xf32, #tpu.memory_space<vmem>>, vector<2x1x32xf32>,
    %c1_i32 = arith.constant 1 : i32
    %c0_17 = arith.constant 0 : index
    %21 = arith.index_cast %c1_i32 : i32 to index
    %c0_18 = arith.constant 0 : index
    %22 = vector.load %arg8[%c0_17, %21, %c0_18] : memref<2x8x32xf32, #tpu.memory_space<vmem>>, vector<2x1x32xf32>
    %23 = vector.shape_cast %22 : vector<2x1x32xf32> to vector<2x32xf32>
    %cst_19 = arith.constant dense<0.000000e+00> : vector<2x32xf32>
    %24 = tpu.matmul %16, %9, %cst_19 {dimension_numbers = #tpu.dot_dimension_numbers<[1], [0], [0], [1], [0, 0, 1, 1], [], []>} : vector<2x32xf32>, vector<32x32xf32>, vector<2x32xf32> -> vector<2x32xf32>
    %25 = arith.addf %23, %24 : vector<2x32xf32>
    %26 = math.tanh %25 : vector<2x32xf32>
    %27 = math.tanh %26 : vector<2x32xf32>
    %28 = vector.shape_cast %27 : vector<2x32xf32> to vector<2x1x32xf32>
    %c0_20 = arith.constant 0 : index
    %29 = arith.index_cast %c1_i32 : i32 to index
    %c0_21 = arith.constant 0 : index
    %30 = vector.load %arg8[%c0_20, %29, %c0_21] : memref<2x8x32xf32, #tpu.memory_space<vmem>>, vector<2x1x32xf32>
    tpu.vector_store %arg8[%c0_20, %29, %c0_21], %28 {strides = array<i32>} : memref<2x8x32xf32, #tpu.memory_space<vmem>>, vector<2x1x32xf32>,
    %c2_i32 = arith.constant 2 : i32
    %c0_22 = arith.constant 0 : index
    %31 = arith.index_cast %c2_i32 : i32 to index
    %c0_23 = arith.constant 0 : index
    %32 = vector.load %arg8[%c0_22, %31, %c0_23] : memref<2x8x32xf32, #tpu.memory_space<vmem>>, vector<2x1x32xf32>
    %33 = vector.shape_cast %32 : vector<2x1x32xf32> to vector<2x32xf32>
    %cst_24 = arith.constant dense<0.000000e+00> : vector<2x32xf32>
    %34 = tpu.matmul %26, %9, %cst_24 {dimension_numbers = #tpu.dot_dimension_numbers<[1], [0], [0], [1], [0, 0, 1, 1], [], []>} : vector<2x32xf32>, vector<32x32xf32>, vector<2x32xf32> -> vector<2x32xf32>
    %35 = arith.addf %33, %34 : vector<2x32xf32>
    %36 = math.tanh %35 : vector<2x32xf32>
    %37 = math.tanh %36 : vector<2x32xf32>
    %38 = vector.shape_cast %37 : vector<2x32xf32> to vector<2x1x32xf32>
    %c0_25 = arith.constant 0 : index
    %39 = arith.index_cast %c2_i32 : i32 to index
    %c0_26 = arith.constant 0 : index
    %40 = vector.load %arg8[%c0_25, %39, %c0_26] : memref<2x8x32xf32, #tpu.memory_space<vmem>>, vector<2x1x32xf32>
    tpu.vector_store %arg8[%c0_25, %39, %c0_26], %38 {strides = array<i32>} : memref<2x8x32xf32, #tpu.memory_space<vmem>>, vector<2x1x32xf32>,
    %c3_i32 = arith.constant 3 : i32
    %c0_27 = arith.constant 0 : index
    %41 = arith.index_cast %c3_i32 : i32 to index
    %c0_28 = arith.constant 0 : index
    %42 = vector.load %arg8[%c0_27, %41, %c0_28] : memref<2x8x32xf32, #tpu.memory_space<vmem>>, vector<2x1x32xf32>
    %43 = vector.shape_cast %42 : vector<2x1x32xf32> to vector<2x32xf32>
    %cst_29 = arith.constant dense<0.000000e+00> : vector<2x32xf32>
    %44 = tpu.matmul %36, %9, %cst_29 {dimension_numbers = #tpu.dot_dimension_numbers<[1], [0], [0], [1], [0, 0, 1, 1], [], []>} : vector<2x32xf32>, vector<32x32xf32>, vector<2x32xf32> -> vector<2x32xf32>
    %45 = arith.addf %43, %44 : vector<2x32xf32>
    %46 = math.tanh %45 : vector<2x32xf32>
    %47 = math.tanh %46 : vector<2x32xf32>
    %48 = vector.shape_cast %47 : vector<2x32xf32> to vector<2x1x32xf32>
    %c0_30 = arith.constant 0 : index
    %49 = arith.index_cast %c3_i32 : i32 to index
    %c0_31 = arith.constant 0 : index
    %50 = vector.load %arg8[%c0_30, %49, %c0_31] : memref<2x8x32xf32, #tpu.memory_space<vmem>>, vector<2x1x32xf32>
    tpu.vector_store %arg8[%c0_30, %49, %c0_31], %48 {strides = array<i32>} : memref<2x8x32xf32, #tpu.memory_space<vmem>>, vector<2x1x32xf32>,
    %c4_i32 = arith.constant 4 : i32
    %c0_32 = arith.constant 0 : index
    %51 = arith.index_cast %c4_i32 : i32 to index
    %c0_33 = arith.constant 0 : index
    %52 = vector.load %arg8[%c0_32, %51, %c0_33] : memref<2x8x32xf32, #tpu.memory_space<vmem>>, vector<2x1x32xf32>
    %53 = vector.shape_cast %52 : vector<2x1x32xf32> to vector<2x32xf32>
    %cst_34 = arith.constant dense<0.000000e+00> : vector<2x32xf32>
    %54 = tpu.matmul %46, %9, %cst_34 {dimension_numbers = #tpu.dot_dimension_numbers<[1], [0], [0], [1], [0, 0, 1, 1], [], []>} : vector<2x32xf32>, vector<32x32xf32>, vector<2x32xf32> -> vector<2x32xf32>
    %55 = arith.addf %53, %54 : vector<2x32xf32>
    %56 = math.tanh %55 : vector<2x32xf32>
    %57 = math.tanh %56 : vector<2x32xf32>
    %58 = vector.shape_cast %57 : vector<2x32xf32> to vector<2x1x32xf32>
    %c0_35 = arith.constant 0 : index
    %59 = arith.index_cast %c4_i32 : i32 to index
    %c0_36 = arith.constant 0 : index
    %60 = vector.load %arg8[%c0_35, %59, %c0_36] : memref<2x8x32xf32, #tpu.memory_space<vmem>>, vector<2x1x32xf32>
    tpu.vector_store %arg8[%c0_35, %59, %c0_36], %58 {strides = array<i32>} : memref<2x8x32xf32, #tpu.memory_space<vmem>>, vector<2x1x32xf32>,
    %c5_i32 = arith.constant 5 : i32
    %c0_37 = arith.constant 0 : index
    %61 = arith.index_cast %c5_i32 : i32 to index
    %c0_38 = arith.constant 0 : index
    %62 = vector.load %arg8[%c0_37, %61, %c0_38] : memref<2x8x32xf32, #tpu.memory_space<vmem>>, vector<2x1x32xf32>
    %63 = vector.shape_cast %62 : vector<2x1x32xf32> to vector<2x32xf32>
    %cst_39 = arith.constant dense<0.000000e+00> : vector<2x32xf32>
    %64 = tpu.matmul %56, %9, %cst_39 {dimension_numbers = #tpu.dot_dimension_numbers<[1], [0], [0], [1], [0, 0, 1, 1], [], []>} : vector<2x32xf32>, vector<32x32xf32>, vector<2x32xf32> -> vector<2x32xf32>
    %65 = arith.addf %63, %64 : vector<2x32xf32>
    %66 = math.tanh %65 : vector<2x32xf32>
    %67 = math.tanh %66 : vector<2x32xf32>
    %68 = vector.shape_cast %67 : vector<2x32xf32> to vector<2x1x32xf32>
    %c0_40 = arith.constant 0 : index
    %69 = arith.index_cast %c5_i32 : i32 to index
    %c0_41 = arith.constant 0 : index
    %70 = vector.load %arg8[%c0_40, %69, %c0_41] : memref<2x8x32xf32, #tpu.memory_space<vmem>>, vector<2x1x32xf32>
    tpu.vector_store %arg8[%c0_40, %69, %c0_41], %68 {strides = array<i32>} : memref<2x8x32xf32, #tpu.memory_space<vmem>>, vector<2x1x32xf32>,
    %c6_i32 = arith.constant 6 : i32
    %c0_42 = arith.constant 0 : index
    %71 = arith.index_cast %c6_i32 : i32 to index
    %c0_43 = arith.constant 0 : index
    %72 = vector.load %arg8[%c0_42, %71, %c0_43] : memref<2x8x32xf32, #tpu.memory_space<vmem>>, vector<2x1x32xf32>
    %73 = vector.shape_cast %72 : vector<2x1x32xf32> to vector<2x32xf32>
    %cst_44 = arith.constant dense<0.000000e+00> : vector<2x32xf32>
    %74 = tpu.matmul %66, %9, %cst_44 {dimension_numbers = #tpu.dot_dimension_numbers<[1], [0], [0], [1], [0, 0, 1, 1], [], []>} : vector<2x32xf32>, vector<32x32xf32>, vector<2x32xf32> -> vector<2x32xf32>
    %75 = arith.addf %73, %74 : vector<2x32xf32>
    %76 = math.tanh %75 : vector<2x32xf32>
    %77 = math.tanh %76 : vector<2x32xf32>
    %78 = vector.shape_cast %77 : vector<2x32xf32> to vector<2x1x32xf32>
    %c0_45 = arith.constant 0 : index
    %79 = arith.index_cast %c6_i32 : i32 to index
    %c0_46 = arith.constant 0 : index
    %80 = vector.load %arg8[%c0_45, %79, %c0_46] : memref<2x8x32xf32, #tpu.memory_space<vmem>>, vector<2x1x32xf32>
    tpu.vector_store %arg8[%c0_45, %79, %c0_46], %78 {strides = array<i32>} : memref<2x8x32xf32, #tpu.memory_space<vmem>>, vector<2x1x32xf32>,
    %c7_i32 = arith.constant 7 : i32
    %c0_47 = arith.constant 0 : index
    %81 = arith.index_cast %c7_i32 : i32 to index
    %c0_48 = arith.constant 0 : index
    %82 = vector.load %arg8[%c0_47, %81, %c0_48] : memref<2x8x32xf32, #tpu.memory_space<vmem>>, vector<2x1x32xf32>
    %83 = vector.shape_cast %82 : vector<2x1x32xf32> to vector<2x32xf32>
    %cst_49 = arith.constant dense<0.000000e+00> : vector<2x32xf32>
    %84 = tpu.matmul %76, %9, %cst_49 {dimension_numbers = #tpu.dot_dimension_numbers<[1], [0], [0], [1], [0, 0, 1, 1], [], []>} : vector<2x32xf32>, vector<32x32xf32>, vector<2x32xf32> -> vector<2x32xf32>
    %85 = arith.addf %83, %84 : vector<2x32xf32>
    %86 = math.tanh %85 : vector<2x32xf32>
    %87 = math.tanh %86 : vector<2x32xf32>
    %88 = vector.shape_cast %87 : vector<2x32xf32> to vector<2x1x32xf32>
    %c0_50 = arith.constant 0 : index
    %89 = arith.index_cast %c7_i32 : i32 to index
    %c0_51 = arith.constant 0 : index
    %90 = vector.load %arg8[%c0_50, %89, %c0_51] : memref<2x8x32xf32, #tpu.memory_space<vmem>>, vector<2x1x32xf32>
    tpu.vector_store %arg8[%c0_50, %89, %c0_51], %88 {strides = array<i32>} : memref<2x8x32xf32, #tpu.memory_space<vmem>>, vector<2x1x32xf32>,
    %c8_i32 = arith.constant 8 : i32
    %c0_52 = arith.constant 0 : index
    %c0_53 = arith.constant 0 : index
    %c0_54 = arith.constant 0 : index
    %91 = vector.load %arg8[%c0_52, %c0_53, %c0_54] : memref<2x8x32xf32, #tpu.memory_space<vmem>>, vector<2x8x32xf32>
    %92 = vector.shape_cast %91 : vector<2x8x32xf32> to vector<16x32xf32>
    %c0_55 = arith.constant 0 : index
    %c0_56 = arith.constant 0 : index
    %93 = vector.load %arg5[%c0_55, %c0_56] : memref<32x4xf32, #tpu.memory_space<vmem>>, vector<32x4xf32>
    %cst_57 = arith.constant dense<0.000000e+00> : vector<16x4xf32>
    %94 = tpu.matmul %92, %93, %cst_57 {dimension_numbers = #tpu.dot_dimension_numbers<[1], [0], [0], [1], [0, 0, 1, 1], [], []>} : vector<16x32xf32>, vector<32x4xf32>, vector<16x4xf32> -> vector<16x4xf32>
    %c0_58 = arith.constant 0 : index
    %c0_59 = arith.constant 0 : index
    %95 = vector.load %arg6[%c0_58, %c0_59] : memref<1x4xf32, #tpu.memory_space<vmem>>, vector<1x4xf32>
    %96 = vector.broadcast %95 : vector<1x4xf32> to vector<16x4xf32>
    %97 = arith.addf %94, %96 : vector<16x4xf32>
    %98 = math.tanh %97 : vector<16x4xf32>
    %99 = vector.shape_cast %98 : vector<16x4xf32> to vector<2x8x4xf32>
    %c0_60 = arith.constant 0 : index
    %c0_61 = arith.constant 0 : index
    %c0_62 = arith.constant 0 : index
    %100 = vector.load %arg7[%c0_60, %c0_61, %c0_62] : memref<2x8x4xf32, #tpu.memory_space<vmem>>, vector<2x8x4xf32>
    tpu.vector_store %arg7[%c0_60, %c0_61, %c0_62], %99 {strides = array<i32>} : memref<2x8x4xf32, #tpu.memory_space<vmem>>, vector<2x8x4xf32>,
    return
  }
  func.func @transform_0(%arg0: i32) -> (i32, i32, i32) {
    %c0_i32 = arith.constant 0 : i32
    %c0_i32_0 = arith.constant 0 : i32
    %c0_i32_1 = arith.constant 0 : i32
    return %arg0, %c0_i32, %c0_i32_0 : i32, i32, i32
  }
  func.func @transform_1(%arg0: i32) -> (i32, i32) {
    %c0_i32 = arith.constant 0 : i32
    %c0_i32_0 = arith.constant 0 : i32
    %c0_i32_1 = arith.constant 0 : i32
    return %c0_i32, %c0_i32_0 : i32, i32
  }
  func.func @transform_2(%arg0: i32) -> (i32, i32) {
    %c0_i32 = arith.constant 0 : i32
    %c0_i32_0 = arith.constant 0 : i32
    %c0_i32_1 = arith.constant 0 : i32
    return %c0_i32, %c0_i32_0 : i32, i32
  }
  func.func @transform_3(%arg0: i32) -> (i32, i32) {
    %c0_i32 = arith.constant 0 : i32
    %c0_i32_0 = arith.constant 0 : i32
    %c0_i32_1 = arith.constant 0 : i32
    return %c0_i32, %c0_i32_0 : i32, i32
  }
  func.func @transform_4(%arg0: i32) -> (i32, i32) {
    %c0_i32 = arith.constant 0 : i32
    %c0_i32_0 = arith.constant 0 : i32
    %c0_i32_1 = arith.constant 0 : i32
    return %c0_i32, %c0_i32_0 : i32, i32
  }
  func.func @transform_5(%arg0: i32) -> (i32, i32) {
    %c0_i32 = arith.constant 0 : i32
    %c0_i32_0 = arith.constant 0 : i32
    %c0_i32_1 = arith.constant 0 : i32
    return %c0_i32, %c0_i32_0 : i32, i32
  }
  func.func @transform_6(%arg0: i32) -> (i32, i32, i32) {
    %c0_i32 = arith.constant 0 : i32
    %c0_i32_0 = arith.constant 0 : i32
    %c0_i32_1 = arith.constant 0 : i32
    return %arg0, %c0_i32, %c0_i32_0 : i32, i32, i32
  }
}

</mosaic_0001>

<bundles_post_ra>
// kernel: tpu_custom_call.1
= control target key start
LH: loop header
LB: loop body
LE: loop exit
PB: predicated region body
PF: predicated region fallthrough
CT: control target
= control target key end

     0   :  { %vm40_vm0 = vcmask 1043456   ;;  %vm33_vm1 = vcmask 31744   ;;  %v1241_v3 = vmov 0.0|0.0   ;;  %vm1242_vm2 = vmmov 0   ;;  %s1415_s1 = inlined_call_operand.vmem [shape: f32[4,32], index: 1, kind: input, shape index: {}]   ;;  %s1416_s0 = inlined_call_operand.vmem [shape: f32[2,8,4], index: 0, kind: input, shape index: {}]   ;;  %s1417_s2 = inlined_call_operand.vmem [shape: f32[32,32], index: 2, kind: input, shape index: {}]   ;;  %s1418_s3 = inlined_call_operand.vmem [shape: f32[1,32], index: 3, kind: input, shape index: {}]   ;;  %s1419_s4 = inlined_call_operand.vmem [shape: f32[32,4], index: 4, kind: input, shape index: {}]   ;;  %s1420_s5 = inlined_call_operand.vmem [shape: f32[1,4], index: 5, kind: input, shape index: {}]   ;;  %s1421_s6 = inlined_call_operand.vmem [shape: f32[2,8,4], index: 6, kind: output, shape index: {}]  }
   0x1   :  { %v25_v0 = vld [vmem:[%s1415_s1] sm:$0xf]  ;;  %v24_v2 = vld [vmem:[%s1416_s0 + $0x8] sm:$0xff]  ;;  %1114 = vmatprep.subr.bf16.mxu1 %v1241_v3  ;;  %v124_v6 = vld [vmem:[%s1417_s2 + $0x10] sm:$0xff]  ;;  %v1243_v9 = vmov 0.0   ;;  %vm119_vm3 = vcmask 261120  }
   0x2   :  { %v23_v1 = vld [vmem:[%s1416_s0] sm:$0xff]  ;;  %1010 = vmatprep.subr.msk.mxu0 %vm40_vm0, %v25_v0  ;;  %v123_v5 = vld [vmem:[%s1417_s2 + $0x8] sm:$0xff]  ;;  %v125_v8 = vld [vmem:[%s1417_s2 + $0x18] sm:$0xff]  ;;  %1023 = vmatprep.mubr.msk.f32.mxu1 %vm1242_vm2, %v1243_v9  ;;  %vm219_vm4 = vcmask 1041409   ;;  %vm211_vm5 = vcmask 253952  }
   0x3   :  { %1012 = vmatprep.mubr.msk.f32.mxu0 %vm33_vm1, %v23_v1  ;;  %v122_v4 = vld [vmem:[%s1417_s2] sm:$0xff]  ;;  %1011 = vmatpush3.msk.msra.mxu0 %vm40_vm0, %v25_v0  ;;  %v1309_v10 = vpack.c.bf16 %v125_v8, %v124_v6 }
   0x4   :  { %v1299_v7 = vpack.c.bf16 %v123_v5, %v122_v4  ;;  %1013 = vmatmul.mubr.msk.f32.vlgmr.msra.gmra.mrb[0].mxu0 %vm33_vm1, %v24_v2  ;;  %1120 = vmatprep.subr.bf16.mxu0 %v1241_v3  ;;  %v947_v11 = vld [vmem:[%s1418_s3] ss:$0 sm:$0xff] }
   0x5   :  { %1034 = vmatprep.mubr.msk.f32.mxu0 %vm1242_vm2, %v1243_v9 }
   0x6   :  { %1116 = vmatpush3.bf16.msra.mxu1 %v1299_v7  ;;  %1122 = vmatpush3.bf16.msra.mxu0 %v1299_v7 }
   0x7   :  { %1117 = vmatprep.subr.bf16.mxu1 %v1241_v3  ;;  %1123 = vmatprep.subr.bf16.mxu0 %v1241_v3 }
   0xa   :  { %1119 = vmatpush3.bf16.msra.mxu1 %v1309_v10  ;;  %1125 = vmatpush3.bf16.msra.mxu0 %v1309_v10 }
   0xb   :  { %1126 = vmatprep.subr.bf16.mxu1 %v1241_v3  ;;  %1132 = vmatprep.subr.bf16.mxu0 %v1241_v3 }
   0xd   :  { %1024 = vmatmul.mubr.f32.vlgmr.msra.gmra.mrb[0].mxu1 %v1243_v9 }
   0xe   :  { %1128 = vmatpush3.bf16.msra.mxu1 %v1299_v7  ;;  %1045 = vmatprep.mubr.msk.f32.mxu1 %vm1242_vm2, %v1243_v9 }
   0xf   :  { %1129 = vmatprep.subr.bf16.mxu1 %v1241_v3 }
  0x12   :  { %1131 = vmatpush3.bf16.msra.mxu1 %v1309_v10 }
  0x13   :  { %1138 = vmatprep.subr.bf16.mxu1 %v1241_v3 }
  0xd7   :  { %v1014_v12 = vpop.f32.mrb[0].mxu0 }
  0xd8   :  { %v116_v13 = vadd.f32 %v1014_v12, %v947_v11  ;;  %v110_v14 = vpop.f32.mrb[1].mxu0 }
  0xd9   :  { %v111_v15 = vadd.f32 %v947_v11, %v110_v14 }
  0xda   :  { %121 = vst.msk [vmem:[#allocation2 + $0x8] sm:$0xff] %vm119_vm3, %v116_v13 }
  0xdb   :  { %120 = vst.msk [vmem:[#allocation2] sm:$0xff] %vm119_vm3, %v111_v15 }
  0xe0   :  { %v197_v16 = vpop.f32.mrb[0].mxu1 }
  0xe1   :  { %v202_v17 = vrot.slane %v197_v16, 1  ;;  %v1025_v18 = vpop.f32.mrb[1].mxu1  ;;  %v127_v19 = vld [vmem:[#allocation2 + $0x8] sm:$0x1]  ;;  %v215_v34 = vld [vmem:[#allocation2 + $0x9] sm:$0x1] }
  0xe2   :  { %v126_v20 = vld [vmem:[#allocation2] sm:$0x1]  ;;  %v214_v29 = vld [vmem:[#allocation2 + $0x1] sm:$0x1]  ;;  %v305_v42 = vld [vmem:[#allocation2 + $0x2] sm:$0x1] }
  0xe3   :  { %v206_v21 = vadd.f32 %v202_v17, %v127_v19  ;;  %v205_v22 = vadd.f32 %v197_v16, %v126_v20  ;;  %v306_v47 = vld [vmem:[#allocation2 + $0xa] sm:$0x1]  ;;  %v395_v55 = vld [vmem:[#allocation2 + $0x3] sm:$0x1]  ;;  %v396_v60 = vld [vmem:[#allocation2 + $0xb] sm:$0x1] }
  0xe4   :  { %v485_v5 = vld [vmem:[#allocation2 + $0x4] sm:$0x1]  ;;  %v486_v13 = vld [vmem:[#allocation2 + $0xc] sm:$0x1] }
  0xe5   :  { %1173 = vtanh.f32 %v206_v21  ;;  %v575_v21 = vld [vmem:[#allocation2 + $0x5] sm:$0x1] }
  0xe6   :  { %1175 = vtanh.f32 %v205_v22 }
  0xef   :  { %v1174_v23 = vpop.eup %1173 }
  0xf0   :  { %v1176_v24 = vpop.eup %1175  ;;  %1177 = vtanh.f32 %v1174_v23  ;;  %v218_v25 = vrot.slane %v1174_v23, 7 }
  0xf1   :  { %1179 = vtanh.f32 %v1176_v24 }
  0xf2   :  { %v220_v26 = vsel %vm219_vm4, %v218_v25, %v1176_v24 }
  0xf3   :  { %1035 = vmatmul.mubr.msk.f32.vlgmr.msra.gmra.mrb[2].mxu0 %vm119_vm3, %v220_v26  ;;  %v576_v26 = vld [vmem:[#allocation2 + $0xd] sm:$0x1] }
  0xf4   :  { %1134 = vmatpush3.bf16.msra.mxu0 %v1299_v7  ;;  %1056 = vmatprep.mubr.msk.f32.mxu0 %vm1242_vm2, %v1243_v9 }
  0xf5   :  { %1135 = vmatprep.subr.bf16.mxu0 %v1241_v3 }
  0xf8   :  { %1137 = vmatpush3.bf16.msra.mxu0 %v1309_v10 }
  0xf9   :  { %1144 = vmatprep.subr.bf16.mxu0 %v1241_v3 }
  0xfa   :  { %v1178_v27 = vpop.eup %1177 }
  0xfb   :  { %v1180_v28 = vpop.eup %1179  ;;  %213 = vst.msk [vmem:[#allocation2 + $0x8] sm:$0x1] %vm211_vm5, %v1178_v27 }
  0xfc   :  { %212 = vst.msk [vmem:[#allocation2] sm:$0x1] %vm211_vm5, %v1180_v28 }
 0x1c6   :  { %v289_v30 = vpop.f32.mrb[2].mxu0 }
 0x1c7   :  { %v294_v31 = vrot.slane %v289_v30, 1  ;;  %v297_v32 = vadd.f32 %v289_v30, %v214_v29  ;;  %v1036_v33 = vpop.f32.mrb[3].mxu0  ;;  %v665_v30 = vld [vmem:[#allocation2 + $0x6] sm:$0x1] }
 0x1c9   :  { %v298_v35 = vadd.f32 %v294_v31, %v215_v34  ;;  %1181 = vtanh.f32 %v297_v32 }
 0x1cb   :  { %1183 = vtanh.f32 %v298_v35  ;;  %v666_v35 = vld [vmem:[#allocation2 + $0xe] sm:$0x1] }
 0x1d3   :  { %v1182_v36 = vpop.eup %1181 }
 0x1d4   :  { %1185 = vtanh.f32 %v1182_v36 }
 0x1d5   :  { %v1184_v37 = vpop.eup %1183 }
 0x1d6   :  { %1187 = vtanh.f32 %v1184_v37  ;;  %v309_v38 = vrot.slane %v1184_v37, 7 }
 0x1d8   :  { %v310_v39 = vsel %vm219_vm4, %v309_v38, %v1182_v36 }
 0x1d9   :  { %1046 = vmatmul.mubr.msk.f32.vlgmr.msra.gmra.mrb[2].mxu1 %vm119_vm3, %v310_v39 }
 0x1da   :  { %1140 = vmatpush3.bf16.msra.mxu1 %v1299_v7  ;;  %1067 = vmatprep.mubr.msk.f32.mxu1 %vm1242_vm2, %v1243_v9 }
 0x1db   :  { %1141 = vmatprep.subr.bf16.mxu1 %v1241_v3 }
 0x1de   :  { %v1186_v40 = vpop.eup %1185  ;;  %1143 = vmatpush3.bf16.msra.mxu1 %v1309_v10 }
 0x1df   :  { %303 = vst.msk [vmem:[#allocation2 + $0x1] sm:$0x1] %vm211_vm5, %v1186_v40  ;;  %1150 = vmatprep.subr.bf16.mxu1 %v1241_v3 }
 0x1e0   :  { %v1188_v41 = vpop.eup %1187 }
 0x1e1   :  { %304 = vst.msk [vmem:[#allocation2 + $0x9] sm:$0x1] %vm211_vm5, %v1188_v41 }
 0x2ac   :  { %v379_v43 = vpop.f32.mrb[2].mxu1 }
 0x2ad   :  { %v384_v44 = vrot.slane %v379_v43, 1  ;;  %v387_v45 = vadd.f32 %v379_v43, %v305_v42  ;;  %v1047_v46 = vpop.f32.mrb[3].mxu1  ;;  %v847_v43 = vld [vmem:[%s1419_s4] sm:$0xff] }
 0x2af   :  { %v388_v48 = vadd.f32 %v384_v44, %v306_v47  ;;  %1189 = vtanh.f32 %v387_v45  ;;  %v848_v44 = vld [vmem:[%s1419_s4 + $0x8] sm:$0xff]  ;;  %v849_v45 = vld [vmem:[%s1419_s4 + $0x10] sm:$0xff]  ;;  %v850_v47 = vld [vmem:[%s1419_s4 + $0x18] sm:$0xff] }
 0x2b0   :  { %v1162_v46 = vpack.c.bf16 %v848_v44, %v847_v43 }
 0x2b1   :  { %1191 = vtanh.f32 %v388_v48  ;;  %v1166_v48 = vpack.c.bf16 %v850_v47, %v849_v45 }
 0x2b9   :  { %v1190_v49 = vpop.eup %1189 }
 0x2ba   :  { %1193 = vtanh.f32 %v1190_v49 }
 0x2bb   :  { %v1192_v50 = vpop.eup %1191 }
 0x2bc   :  { %1195 = vtanh.f32 %v1192_v50  ;;  %v399_v51 = vrot.slane %v1192_v50, 7 }
 0x2be   :  { %v400_v52 = vsel %vm219_vm4, %v399_v51, %v1190_v49  ;;  %v755_v49 = vld [vmem:[#allocation2 + $0x7] sm:$0x1] }
 0x2bf   :  { %1057 = vmatmul.mubr.msk.f32.vlgmr.msra.gmra.mrb[4].mxu0 %vm119_vm3, %v400_v52 }
 0x2c0   :  { %1146 = vmatpush3.bf16.msra.mxu0 %v1299_v7  ;;  %1078 = vmatprep.mubr.msk.f32.mxu0 %vm1242_vm2, %v1243_v9 }
 0x2c1   :  { %1147 = vmatprep.subr.bf16.mxu0 %v1241_v3 }
 0x2c4   :  { %v1194_v53 = vpop.eup %1193  ;;  %1149 = vmatpush3.bf16.msra.mxu0 %v1309_v10 }
 0x2c5   :  { %393 = vst.msk [vmem:[#allocation2 + $0x2] sm:$0x1] %vm211_vm5, %v1194_v53  ;;  %1156 = vmatprep.subr.bf16.mxu0 %v1241_v3 }
 0x2c6   :  { %v1196_v54 = vpop.eup %1195 }
 0x2c7   :  { %394 = vst.msk [vmem:[#allocation2 + $0xa] sm:$0x1] %vm211_vm5, %v1196_v54  ;;  %v756_v54 = vld [vmem:[#allocation2 + $0xf] sm:$0x1] }
 0x392   :  { %v469_v56 = vpop.f32.mrb[4].mxu0 }
 0x393   :  { %v474_v57 = vrot.slane %v469_v56, 1  ;;  %v477_v58 = vadd.f32 %v469_v56, %v395_v55  ;;  %v1058_v59 = vpop.f32.mrb[5].mxu0 }
 0x395   :  { %v478_v61 = vadd.f32 %v474_v57, %v396_v60  ;;  %1197 = vtanh.f32 %v477_v58 }
 0x397   :  { %1199 = vtanh.f32 %v478_v61 }
 0x39f   :  { %v1198_v62 = vpop.eup %1197 }
 0x3a0   :  { %1201 = vtanh.f32 %v1198_v62 }
 0x3a1   :  { %v1200_v63 = vpop.eup %1199 }
 0x3a2   :  { %1203 = vtanh.f32 %v1200_v63  ;;  %v489_v0 = vrot.slane %v1200_v63, 7 }
 0x3a4   :  { %v490_v1 = vsel %vm219_vm4, %v489_v0, %v1198_v62  ;;  %v958_v62 = vld [vmem:[%s1420_s5] ss:$0 sm:$0xff] }
 0x3a5   :  { %1068 = vmatmul.mubr.msk.f32.vlgmr.msra.gmra.mrb[4].mxu1 %vm119_vm3, %v490_v1 }
 0x3a6   :  { %1152 = vmatpush3.bf16.msra.mxu1 %v1299_v7  ;;  %1089 = vmatprep.mubr.msk.f32.mxu1 %vm1242_vm2, %v1243_v9 }
 0x3a7   :  { %1153 = vmatprep.subr.bf16.mxu1 %v1241_v3 }
 0x3aa   :  { %v1202_v2 = vpop.eup %1201  ;;  %1155 = vmatpush3.bf16.msra.mxu1 %v1309_v10 }
 0x3ab   :  { %483 = vst.msk [vmem:[#allocation2 + $0x3] sm:$0x1] %vm211_vm5, %v1202_v2  ;;  %1163 = vmatprep.subr.bf16.mxu1 %v1162_v46 }
 0x3ac   :  { %v1204_v4 = vpop.eup %1203 }
 0x3ad   :  { %484 = vst.msk [vmem:[#allocation2 + $0xb] sm:$0x1] %vm211_vm5, %v1204_v4 }
 0x478   :  { %v559_v6 = vpop.f32.mrb[4].mxu1 }
 0x479   :  { %v564_v8 = vrot.slane %v559_v6, 1  ;;  %v567_v11 = vadd.f32 %v559_v6, %v485_v5  ;;  %v1069_v12 = vpop.f32.mrb[5].mxu1 }
 0x47b   :  { %v568_v14 = vadd.f32 %v564_v8, %v486_v13  ;;  %1205 = vtanh.f32 %v567_v11 }
 0x47d   :  { %1207 = vtanh.f32 %v568_v14 }
 0x485   :  { %v1206_v15 = vpop.eup %1205 }
 0x486   :  { %1209 = vtanh.f32 %v1206_v15 }
 0x487   :  { %v1208_v16 = vpop.eup %1207 }
 0x488   :  { %1211 = vtanh.f32 %v1208_v16  ;;  %v579_v17 = vrot.slane %v1208_v16, 7 }
 0x48a   :  { %v580_v18 = vsel %vm219_vm4, %v579_v17, %v1206_v15 }
 0x48b   :  { %1079 = vmatmul.mubr.msk.f32.vlgmr.msra.gmra.mrb[6].mxu0 %vm119_vm3, %v580_v18 }
 0x48c   :  { %1158 = vmatpush3.bf16.msra.mxu0 %v1299_v7  ;;  %1100 = vmatprep.mubr.msk.f32.mxu0 %vm1242_vm2, %v1243_v9 }
 0x48d   :  { %1159 = vmatprep.subr.bf16.mxu0 %v1241_v3 }
 0x490   :  { %v1210_v19 = vpop.eup %1209  ;;  %1161 = vmatpush3.bf16.msra.mxu0 %v1309_v10 }
 0x491   :  { %573 = vst.msk [vmem:[#allocation2 + $0x4] sm:$0x1] %vm211_vm5, %v1210_v19 }
 0x492   :  { %v1212_v20 = vpop.eup %1211 }
 0x493   :  { %574 = vst.msk [vmem:[#allocation2 + $0xc] sm:$0x1] %vm211_vm5, %v1212_v20 }
 0x55e   :  { %v649_v22 = vpop.f32.mrb[6].mxu0 }
 0x55f   :  { %v654_v23 = vrot.slane %v649_v22, 1  ;;  %v657_v24 = vadd.f32 %v649_v22, %v575_v21  ;;  %v1080_v25 = vpop.f32.mrb[7].mxu0 }
 0x561   :  { %v658_v7 = vadd.f32 %v654_v23, %v576_v26  ;;  %1213 = vtanh.f32 %v657_v24 }
 0x563   :  { %1215 = vtanh.f32 %v658_v7 }
 0x56b   :  { %v1214_v9 = vpop.eup %1213 }
 0x56c   :  { %1217 = vtanh.f32 %v1214_v9 }
 0x56d   :  { %v1216_v3 = vpop.eup %1215 }
 0x56e   :  { %1219 = vtanh.f32 %v1216_v3  ;;  %v669_v27 = vrot.slane %v1216_v3, 7 }
 0x570   :  { %v670_v10 = vsel %vm219_vm4, %v669_v27, %v1214_v9 }
 0x571   :  { %1090 = vmatmul.mubr.msk.f32.vlgmr.msra.gmra.mrb[6].mxu1 %vm119_vm3, %v670_v10 }
 0x572   :  { %1165 = vmatpush3.bf16.msra.mxu1 %v1162_v46 }
 0x573   :  { %1167 = vmatprep.subr.bf16.mxu1 %v1166_v48 }
 0x576   :  { %v1218_v28 = vpop.eup %1217  ;;  %1169 = vmatpush3.bf16.msra.mxu1 %v1166_v48 }
 0x577   :  { %663 = vst.msk [vmem:[#allocation2 + $0x5] sm:$0x1] %vm211_vm5, %v1218_v28 }
 0x578   :  { %v1220_v29 = vpop.eup %1219 }
 0x579   :  { %664 = vst.msk [vmem:[#allocation2 + $0xd] sm:$0x1] %vm211_vm5, %v1220_v29 }
 0x644   :  { %v739_v31 = vpop.f32.mrb[6].mxu1 }
 0x645   :  { %v744_v32 = vrot.slane %v739_v31, 1  ;;  %v747_v33 = vadd.f32 %v739_v31, %v665_v30  ;;  %v1091_v34 = vpop.f32.mrb[7].mxu1 }
 0x647   :  { %v748_v36 = vadd.f32 %v744_v32, %v666_v35  ;;  %1221 = vtanh.f32 %v747_v33 }
 0x649   :  { %1223 = vtanh.f32 %v748_v36 }
 0x651   :  { %v1222_v37 = vpop.eup %1221 }
 0x652   :  { %1225 = vtanh.f32 %v1222_v37 }
 0x653   :  { %v1224_v38 = vpop.eup %1223 }
 0x654   :  { %1227 = vtanh.f32 %v1224_v38  ;;  %v759_v39 = vrot.slane %v1224_v38, 7 }
 0x656   :  { %v760_v40 = vsel %vm219_vm4, %v759_v39, %v1222_v37 }
 0x657   :  { %1101 = vmatmul.mubr.msk.f32.vlgmr.msra.gmra.mrb[8].mxu0 %vm119_vm3, %v760_v40 }
 0x65c   :  { %v1226_v41 = vpop.eup %1225 }
 0x65d   :  { %753 = vst.msk [vmem:[#allocation2 + $0x6] sm:$0x1] %vm211_vm5, %v1226_v41 }
 0x65e   :  { %v1228_v42 = vpop.eup %1227 }
 0x65f   :  { %754 = vst.msk [vmem:[#allocation2 + $0xe] sm:$0x1] %vm211_vm5, %v1228_v42 }
 0x72a   :  { %v829_v50 = vpop.f32.mrb[8].mxu0 }
 0x72b   :  { %v834_v51 = vrot.slane %v829_v50, 1  ;;  %v837_v52 = vadd.f32 %v829_v50, %v755_v49  ;;  %v1102_v53 = vpop.f32.mrb[9].mxu0 }
 0x72d   :  { %v838_v55 = vadd.f32 %v834_v51, %v756_v54  ;;  %1229 = vtanh.f32 %v837_v52 }
 0x72f   :  { %1231 = vtanh.f32 %v838_v55 }
 0x737   :  { %v1230_v56 = vpop.eup %1229 }
 0x738   :  { %1233 = vtanh.f32 %v1230_v56 }
 0x739   :  { %v1232_v57 = vpop.eup %1231 }
 0x73a   :  { %1235 = vtanh.f32 %v1232_v57 }
 0x742   :  { %v1234_v58 = vpop.eup %1233 }
 0x743   :  { %843 = vst.msk [vmem:[#allocation2 + $0x7] sm:$0x1] %vm211_vm5, %v1234_v58 }
 0x744   :  { %v1236_v59 = vpop.eup %1235 }
 0x745   :  { %844 = vst.msk [vmem:[#allocation2 + $0xf] sm:$0x1] %vm211_vm5, %v1236_v59 }
 0x74a   :  { %v845_v60 = vld [vmem:[#allocation2] sm:$0xff] }
 0x74b   :  { %1111 = vmatprep.mubr.msk.f32.mxu1 %vm119_vm3, %v845_v60 }
 0x74c   :  { %v846_v61 = vld [vmem:[#allocation2 + $0x8] sm:$0xff] }
 0x74d   :  { %1112 = vmatmul.mubr.msk.f32.vlgmr.msra.gmra.mrb[8].mxu1 %vm119_vm3, %v846_v61 }
 0x820   :  { %v1113_v63 = vpop.f32.mrb[8].mxu1 }
 0x821   :  { %v936_v0 = vadd.f32 %v1113_v63, %v958_v62  ;;  %v930_v1 = vpop.f32.mrb[9].mxu1 }
 0x822   :  { %v931_v2 = vadd.f32 %v958_v62, %v930_v1 }
 0x823   :  { %1237 = vtanh.f32 %v936_v0 }
 0x824   :  { %1239 = vtanh.f32 %v931_v2 }
 0x82d   :  { %v1238_v4 = vpop.eup %1237 }
 0x82e   :  { %v1240_v5 = vpop.eup %1239  ;;  %942 = vst.msk [vmem:[%s1421_s6 + $0x8] sm:$0xff] %vm33_vm1, %v1238_v4 }
 0x82f   :  { %941 = vst.msk [vmem:[%s1421_s6] sm:$0xff] %vm33_vm1, %v1240_v5 }

</bundles_post_ra>
